<compile_context>
chip_gen: v5e
topology: v5e:2x2
jax: 0.10.0
libtpu: 0.0.40
codegen_flags: <defaults>
</compile_context>

<pallas_src>
import functools

import numpy as np
import jax
import jax.numpy as jnp
from jax.experimental import pallas as pl
from jax.experimental.pallas import tpu as pltpu

_EPS_SQ = 1e-24        # F.normalize uses eps=1e-12 on the norm -> eps**2 on sum-of-squares
_NEG_BIG = -1e30       # finite "-inf": masked / fully-padded tiles never produce NaNs
_STABLE_TEMP_LIMIT = 60.0  # exp(60) * ~1e7 columns still far below f32 max


def _cdiv(a, b):
    return -(-a // b)


def _round_up(x, m):
    return _cdiv(x, m) * m


# ----------------------------- kernel ----------------------------------------


def _symmetric_contrastive_kernel(
    # inputs
    tgt_hbm,      # (bs, D)  target, memory_space=ANY (stays in HBM; DMA'd once)
    pred_ref,     # (T, D)   pred column tile (pipelined by BlockSpec)
    # outputs
    text_ref,     # (1, T)   f32 per-column text loss (lane dense)
    stats_ref,    # (bs,128) f32 packed per-split row stats: lane0=m, 1=sumexp, 2=diag
    # scratch
    tgt_stage,    # (bs, D)  target dtype: single-buffered staging for the DMA
    tgt_sc,       # (bs, D)  bf16: normalized * temperature target (MXU operand)
    m_sc,         # (bs, 1)  f32 running row max (stays 0 when not stabilizing)
    l_sc,         # (bs, 1)  f32 running row sum-exp
    diag_sc,      # (bs, 1)  f32 running sum of label-masked logits per row
    copy_sem,     # DMA semaphore for the one-shot target copy
    *,
    temperature, n, n_valid, tile_cols, tiles_per_split, need_tail_mask, stabilize,
):
    c = pl.program_id(0)   # TensorCore split (parallel)
    j = pl.program_id(1)   # column tile within this split (reduction axis)
    bs = tgt_sc.shape[0]

    @pl.when(j == 0)
    def _init():
        # One-shot, single-buffered copy of the small target operand.
        cp = pltpu.make_async_copy(tgt_hbm, tgt_stage, copy_sem)
        cp.start()
        cp.wait()
        tgt = tgt_stage[...].astype(jnp.float32)
        inv = jax.lax.rsqrt(
            jnp.maximum(jnp.sum(tgt * tgt, axis=1, keepdims=True), _EPS_SQ))
        # Fold the temperature into the small (bs, D) operand; cache as bf16.
        tgt_sc[...] = (tgt * (inv * temperature)).astype(jnp.bfloat16)
        m_sc[...] = jnp.full(m_sc.shape, _NEG_BIG if stabilize else 0.0, jnp.float32)
        l_sc[...] = jnp.zeros(l_sc.shape, jnp.float32)
        diag_sc[...] = jnp.zeros(diag_sc.shape, jnp.float32)

    # Normalize this pred tile (f32 math, bf16 MXU operand).
    # TODO(synk): when bs << D it is cheaper to feed the raw bf16 tile to the
    # MXU and scale the (bs, T) logits by inv_p instead (needs a (T,1)->(1,T)
    # relayout); gated off for now.
    p = pred_ref[...].astype(jnp.float32)                             # (T, D)
    inv_p = jax.lax.rsqrt(
        jnp.maximum(jnp.sum(p * p, axis=1, keepdims=True), _EPS_SQ))
    p_n = (p * inv_p).astype(jnp.bfloat16)                            # (T, D)

    # logits[i, k] = temperature * <tgt_n[i], pred_n[k]> -- MXU, no transpose,
    # bf16 operands with f32 accumulation.
    logits = jax.lax.dot_general(
        tgt_sc[...], p_n,
        dimension_numbers=(((1,), (1,)), ((), ())),
        preferred_element_type=jnp.float32)                           # (bs, T)

    col0 = (c * tiles_per_split + j) * tile_cols
    row = jax.lax.broadcasted_iota(jnp.int32, (bs, tile_cols), 0)
    col = jax.lax.broadcasted_iota(jnp.int32, (bs, tile_cols), 1) + col0
    # Label mask fused into one unsigned compare: 0 <= col - row*n < n.
    # (Padded pred columns are >= n_valid = bs*n and can never match.)
    mask = (col - row * n).astype(jnp.uint32) < np.uint32(n)
    masked_logits = jnp.where(mask, logits, 0.0)
    diag_sc[...] += jnp.sum(masked_logits, axis=1, keepdims=True)
    picked = jnp.sum(masked_logits, axis=0, keepdims=True)            # (1, T)

    # Only tiles that actually contain padded (>= n_valid) columns pay for the
    # validity select; every other tile takes the unmasked fast path.
    needs_mask_now = col0 + tile_cols > n_valid

    if stabilize:
        # General path (very large temperature): online max-stabilized row LSE.
        def row_update(lrs):
            m_prev = m_sc[...]
            m_new = jnp.maximum(m_prev, jnp.max(lrs, axis=1, keepdims=True))
            l_sc[...] = (l_sc[...] * jnp.exp(m_prev - m_new)
                         + jnp.sum(jnp.exp(lrs - m_new), axis=1, keepdims=True))
            m_sc[...] = m_new

        if need_tail_mask:
            @pl.when(needs_mask_now)
            def _():
                row_update(jnp.where(col < n_valid, logits, _NEG_BIG))

            @pl.when(jnp.logical_not(needs_mask_now))
            def _():
                row_update(logits)
        else:
            row_update(logits)

        m_col = jnp.max(logits, axis=0, keepdims=True)                # (1, T)
        lse_col = m_col + jnp.log(
            jnp.sum(jnp.exp(logits - m_col), axis=0, keepdims=True))
        text_ref[...] = lse_col - picked
    else:
        # |logits| <= temperature, so exp() cannot overflow f32: one EUP exp per
        # tile, shared by the row running sum and the column LSE.  No running
        # max, no rescale exp, no (bs, T) max reductions.
        e = jnp.exp(logits)                                           # (bs, T)

        if need_tail_mask:
            @pl.when(needs_mask_now)
            def _():
                l_sc[...] += jnp.sum(jnp.where(col < n_valid, e, 0.0),
                                     axis=1, keepdims=True)

            @pl.when(jnp.logical_not(needs_mask_now))
            def _():
                l_sc[...] += jnp.sum(e, axis=1, keepdims=True)
        else:
            l_sc[...] += jnp.sum(e, axis=1, keepdims=True)

        text_ref[...] = jnp.log(jnp.sum(e, axis=0, keepdims=True)) - picked

    # Emit this split's packed partial row statistics on its last tile; the
    # wrapper combines the per-split (m, l, diag) with a per-row log-sum-exp.
    @pl.when(j == tiles_per_split - 1)
    def _finalize():
        lane = jax.lax.broadcasted_iota(jnp.int32, (bs, 128), 1)
        stats_ref[...] = jnp.where(
            lane == 0, m_sc[...],
            jnp.where(lane == 1, l_sc[...], diag_sc[...]))


# ----------------------------- planning helpers ------------------------------


def _default_num_splits():
    # v4 / v5p / v7x expose two TensorCores per Pallas device; v5e/v6e have one.
    try:
        kind = jax.devices()[0].device_kind.lower()
    except Exception:
        return 1
    if any(tag in kind for tag in ("v7", "tpu7", "v4", "v5p")):
        return 2
    return 1


def _plan_tiling(bs, d, bsn, num_splits, pred_itemsize, tgt_itemsize, tile_cols):
    """Chip- and bs-aware tile width + VMEM limit computed from buffer sizes."""
    try:
        vmem_cap = int(pltpu.get_tpu_info().vmem_capacity_bytes)
    except Exception:
        vmem_cap = 64 * 1024 * 1024  # conservative fallback (v7x-sized)
    # Resident, single-buffered state: raw target stage + normalized bf16 copy
    # + packed stats output (double buffered) + slack for small scratch.
    fixed = bs * d * (tgt_itemsize + 2) + 2 * bs * 128 * 4 + (256 << 10)
    # Per column of tile width: double-buffered pred tile, ~6 live (bs, tile)
    # f32 temporaries on the logits path, double-buffered f32 text output row.
    per_col = 2 * d * pred_itemsize + 6 * bs * 4 + 2 * 4
    if tile_cols is None:
        budget = int(vmem_cap * 0.70)
        tile_cols = max(128, min(2048, (budget - fixed) // per_col))
        tile_cols = tile_cols // 128 * 128
    else:
        tile_cols = _round_up(max(int(tile_cols), 1), 128)
    # Don't over-pad small problems.
    tile_cols = max(128, min(tile_cols, _round_up(_cdiv(bsn, num_splits), 128)))
    need = fixed + per_col * tile_cols
    vmem_limit = int(max(32 << 20, min(2 * need, int(0.90 * vmem_cap))))
    vmem_limit = int(min(max(vmem_limit, need + (4 << 20)), int(0.95 * vmem_cap)))
    return tile_cols, vmem_limit


# ----------------------------- wrapper ----------------------------------------


def symmetric_contrastive_loss(semantic_target, pred_semantic, logits_scale=None, *,
                               temperature, tile_cols=None, num_splits=None,
                               stream_pred_bf16=True):
    """JAX/Pallas equivalent of SymmetricContrastiveLoss.forward.

    Like the PyTorch module, `logits_scale` is accepted and ignored; the
    temperature baked at construction time (np.exp(temperature)) is used.
    The matmul runs on bf16 operands with f32 accumulation; softmax math in f32.
    """
    del logits_scale  # unused, exactly as in the reference module
    if pred_semantic.ndim == 2:
        pred_semantic = pred_semantic[:, None, :]
    bs, n, d = pred_semantic.shape
    bsn = bs * n
    temp = float(np.exp(temperature))
    # Cosine similarities are bounded by 1, so |logits| <= temp: for modest
    # temperatures exp(logits) cannot overflow f32 and both softmaxes skip max
    # stabilization (single exp per tile).  Huge temps take the general path.
    stabilize = temp > _STABLE_TEMP_LIMIT

    if num_splits is None:
        num_splits = _default_num_splits()
    num_splits = max(1, min(int(num_splits), _cdiv(bsn, 128)))

    # TODO(synk): pad bs to a multiple of 8 (and mask the padded rows out of
    # both losses) for tiny-bs deployments where sublanes go half-used.
    pred_flat = pred_semantic.reshape(bsn, d)
    if stream_pred_bf16 and pred_flat.dtype == jnp.float32:
        # The kernel is HBM-bound for small bs: halve the dominant stream.
        pred_flat = pred_flat.astype(jnp.bfloat16)

    tile_cols, vmem_limit = _plan_tiling(
        bs, d, bsn, num_splits,
        pred_itemsize=pred_flat.dtype.itemsize,
        tgt_itemsize=semantic_target.dtype.itemsize,
        tile_cols=tile_cols)

    padded = _round_up(bsn, tile_cols * num_splits)
    tiles_total = padded // tile_cols
    tiles_per_split = tiles_total // num_splits
    if padded != bsn:
        # Deterministic zero padding; padded columns are masked in-kernel.
        pred_flat = jnp.pad(pred_flat, ((0, padded - bsn), (0, 0)))

    kernel = functools.partial(
        _symmetric_contrastive_kernel,
        temperature=temp, n=n, n_valid=bsn, tile_cols=tile_cols,
        tiles_per_split=tiles_per_split,
        need_tail_mask=(padded != bsn), stabilize=stabilize)

    grid_spec = pltpu.PrefetchScalarGridSpec(
        num_scalar_prefetch=0,
        grid=(num_splits, tiles_per_split),
        in_specs=[
            # Target stays in HBM; DMA'd once per core into scratch, so the
            # pipeline does not allocate a pointless second buffer for it.
            pl.BlockSpec(memory_space=pl.ANY),
            # Pred is streamed in lane-dense (tile_cols, D) tiles.
            # TODO(synk): sweep pipeline_mode=pl.Buffered(3) here for tiny-D,
            # latency-bound shapes once the default pipeline shows exposed DMA.
            pl.BlockSpec((tile_cols, d),
                         lambda c, j: (c * tiles_per_split + j, 0)),
        ],
        out_specs=[
            pl.BlockSpec((1, tile_cols),
                         lambda c, j: (0, c * tiles_per_split + j)),
            pl.BlockSpec((bs, 128), lambda c, j: (0, c)),
        ],
        scratch_shapes=[
            pltpu.VMEM((bs, d), semantic_target.dtype),  # target DMA stage
            pltpu.VMEM((bs, d), jnp.bfloat16),           # normalized*temp target
            pltpu.VMEM((bs, 1), jnp.float32),            # running row max
            pltpu.VMEM((bs, 1), jnp.float32),            # running row sum-exp
            pltpu.VMEM((bs, 1), jnp.float32),            # running diag sum
            pltpu.SemaphoreType.DMA,                     # target copy semaphore
        ],
    )

    text_pad, stats = pl.pallas_call(
        kernel,
        out_shape=(
            jax.ShapeDtypeStruct((1, padded), jnp.float32),
            jax.ShapeDtypeStruct((bs, num_splits * 128), jnp.float32),
        ),
        grid_spec=grid_spec,
        compiler_params=pltpu.CompilerParams(
            # The split axis is independent work (megacore on v7x/v4/v5p); the
            # column-tile axis carries the per-row accumulators.
            dimension_semantics=("parallel", "arbitrary"),
            vmem_limit_bytes=vmem_limit,
        ),
    )(semantic_target, pred_flat)

    # Wrapper epilogue: combine the per-split row statistics with a per-row
    # log-sum-exp, slice off tile padding, and add the scalar target loss.
    m = stats[:, 0::128]        # (bs, num_splits) running max (0 if unstabilized)
    l = stats[:, 1::128]        # (bs, num_splits) running sum-exp
    dg = stats[:, 2::128]       # (bs, num_splits) running diag sums
    m_max = jnp.max(m, axis=1, keepdims=True)
    lse_row = m_max[:, 0] + jnp.log(jnp.sum(jnp.exp(m - m_max) * l, axis=1))
    diag = jnp.sum(dg, axis=1)
    target_loss = (jnp.float32(n) * jnp.sum(lse_row) - jnp.sum(diag)) / bs
    text_loss = text_pad[0, :bsn].reshape(bs, n)
    loss = (target_loss + text_loss) * 0.5
    return {'semantic_loss': loss}


# ----------------------------- references ------------------------------------


def _reference_f32(semantic_target, pred_semantic, temperature):
    """Pure-JAX f32 mirror of the PyTorch forward."""
    if pred_semantic.ndim == 2:
        pred_semantic = pred_semantic[:, None, :]
    bs, n, d = pred_semantic.shape
    temp = np.exp(temperature)
    tgt = semantic_target / jnp.maximum(
        jnp.linalg.norm(semantic_target, axis=1, keepdims=True), 1e-12)
    pred = pred_semantic / jnp.maximum(
        jnp.linalg.norm(pred_semantic, axis=2, keepdims=True), 1e-12)
    pred = pred.reshape(bs * n, d)
    logits = tgt @ pred.T * temp
    labels = jnp.repeat(jnp.eye(bs, dtype=jnp.float32), n, axis=1)
    target_loss = -jnp.sum(labels * jax.nn.log_softmax(logits, axis=1)) / bs
    col_labels = jnp.repeat(jnp.arange(bs), n)
    logp_col = jax.nn.log_softmax(logits.T, axis=1)
    text_loss = -logp_col[jnp.arange(bs * n), col_labels].reshape(bs, n)
    return (target_loss + text_loss) / 2


def _reference_kernel_numerics(semantic_target, pred_semantic, temperature,
                               stream_pred_bf16=True):
    """Mirror of the kernel numerics (bf16 streamed pred, bf16 MXU operands)."""
    if pred_semantic.ndim == 2:
        pred_semantic = pred_semantic[:, None, :]
    bs, n, d = pred_semantic.shape
    temp = jnp.float32(np.exp(temperature))
    tgt = semantic_target.astype(jnp.float32)
    inv_t = jax.lax.rsqrt(jnp.maximum(jnp.sum(tgt * tgt, axis=1, keepdims=True), _EPS_SQ))
    tgt_n = (tgt * (inv_t * temp)).astype(jnp.bfloat16).astype(jnp.float32)
    pred = pred_semantic.reshape(bs * n, d)
    if stream_pred_bf16 and pred.dtype == jnp.float32:
        pred = pred.astype(jnp.bfloat16)
    pred = pred.astype(jnp.float32)
    inv_p = jax.lax.rsqrt(jnp.maximum(jnp.sum(pred * pred, axis=1, keepdims=True), _EPS_SQ))
    pred_n = (pred * inv_p).astype(jnp.bfloat16).astype(jnp.float32)
    logits = tgt_n @ pred_n.T
    labels = jnp.repeat(jnp.eye(bs, dtype=jnp.float32), n, axis=1)
    target_loss = -jnp.sum(labels * jax.nn.log_softmax(logits, axis=1)) / bs
    col_labels = jnp.repeat(jnp.arange(bs), n)
    logp_col = jax.nn.log_softmax(logits.T, axis=1)
    text_loss = -logp_col[jnp.arange(bs * n), col_labels].reshape(bs, n)
    return (target_loss + text_loss) / 2


if __name__ == "__main__":
    key = jax.random.PRNGKey(0)
    k1, k2, k3, k4, k5, k6 = jax.random.split(key, 6)
    logits_scale = jnp.float32(1.0)   # accepted and ignored, as in the module

    # 1) Small single-tile case: auto tiling / auto core split.
    bs, n, d = 4, 2, 32
    temperature = 0.07   # module applies np.exp(temperature) internally
    st = jax.random.normal(k1, (bs, d), dtype=jnp.float32)
    ps = jax.random.normal(k2, (bs, n, d), dtype=jnp.float32)
    out = symmetric_contrastive_loss(st, ps, logits_scale, temperature=temperature)
    loss = jax.block_until_ready(out['semantic_loss'])
    np.testing.assert_allclose(
        np.asarray(loss),
        np.asarray(_reference_kernel_numerics(st, ps, temperature)),
        rtol=2e-3, atol=2e-3)
    np.testing.assert_allclose(
        np.asarray(loss),
        np.asarray(_reference_f32(st, ps, temperature)),
        rtol=5e-2, atol=5e-2)

    # 2) Multi-tile + forced 2-way core split: exercises online row
    #    accumulation across tiles, a partially-padded tile, a fully-padded
    #    tile, and the wrapper-side per-split combine.
    bs2, n2, d2 = 8, 40, 32     # bs*n = 320 -> 4 tiles of 128, 2 per split
    st2 = jax.random.normal(k3, (bs2, d2), dtype=jnp.float32)
    ps2 = jax.random.normal(k4, (bs2, n2, d2), dtype=jnp.float32)
    out2 = symmetric_contrastive_loss(st2, ps2, logits_scale,
                                      temperature=temperature,
                                      tile_cols=128, num_splits=2)
    loss2 = jax.block_until_ready(out2['semantic_loss'])
    np.testing.assert_allclose(
        np.asarray(loss2),
        np.asarray(_reference_kernel_numerics(st2, ps2, temperature)),
        rtol=2e-3, atol=2e-3)
    np.testing.assert_allclose(
        np.asarray(loss2),
        np.asarray(_reference_f32(st2, ps2, temperature)),
        rtol=5e-2, atol=5e-2)

    # 3) Large temperature -> exercises the max-stabilized fallback path
    #    (checked only against the kernel-numerics mirror: bf16 logit error
    #    times exp(5) legitimately diverges from the pure-f32 model).
    bs3, n3, d3 = 8, 20, 32     # bs*n = 160 -> tail-masked second split
    st3 = jax.random.normal(k5, (bs3, d3), dtype=jnp.float32)
    ps3 = jax.random.normal(k6, (bs3, n3, d3), dtype=jnp.float32)
    out3 = symmetric_contrastive_loss(st3, ps3, logits_scale,
                                      temperature=5.0,
                                      tile_cols=128, num_splits=2)
    loss3 = jax.block_until_ready(out3['semantic_loss'])
    np.testing.assert_allclose(
        np.asarray(loss3),
        np.asarray(_reference_kernel_numerics(st3, ps3, 5.0)),
        rtol=5e-3, atol=1e-2)

    print("KERNEL_OK")
</pallas_src>

<mosaic_0001>
module attributes {stable_mosaic.version = 11 : i64} {
  func.func @_symmetric_contrastive_kernel(%arg0: i32, %arg1: i32, %arg2: memref<4x32xf32, #tpu.memory_space<any>>, %arg3: memref<128x32xbf16, #tpu.memory_space<vmem>>, %arg4: memref<1x128xf32, #tpu.memory_space<vmem>>, %arg5: memref<4x128xf32, #tpu.memory_space<vmem>>, %arg6: memref<4x32xf32, #tpu.memory_space<vmem>>, %arg7: memref<4x32xbf16, #tpu.memory_space<vmem>>, %arg8: memref<4x1xf32, #tpu.memory_space<vmem>>, %arg9: memref<4x1xf32, #tpu.memory_space<vmem>>, %arg10: memref<4x1xf32, #tpu.memory_space<vmem>>, %arg11: memref<!tpu.dma_semaphore, #tpu.memory_space<semaphore_mem>>) attributes {dimension_semantics = [#tpu.dimension_semantics<parallel>, #tpu.dimension_semantics<arbitrary>], iteration_bounds = array<i64: 1, 1>, scalar_prefetch = 0 : i64, scratch_operands = 6 : i64, tpu.core_type = #tpu.core_type<tc>, window_params = [{}, {transform_indices = @transform_1, window_bounds = array<i64: 128, 32>}, {transform_indices = @transform_2, window_bounds = array<i64: 1, 128>}, {transform_indices = @transform_3, window_bounds = array<i64: 4, 128>}]} {
    %c0_i32 = arith.constant 0 : i32
    %0 = arith.cmpi eq, %arg1, %c0_i32 : i32
    %1 = arith.extui %0 : i1 to i32
    %c0_i32_0 = arith.constant 0 : i32
    %2 = arith.cmpi ne, %1, %c0_i32_0 : i32
    scf.if %2 {
      tpu.enqueue_dma source(%arg2 : memref<4x32xf32, #tpu.memory_space<any>>) target(%arg6 : memref<4x32xf32, #tpu.memory_space<vmem>>) target_semaphore(%arg11 : memref<!tpu.dma_semaphore, #tpu.memory_space<semaphore_mem>>)
      tpu.wait_dma2 semaphore(%arg11 : memref<!tpu.dma_semaphore, #tpu.memory_space<semaphore_mem>>) src(%arg2 : memref<4x32xf32, #tpu.memory_space<any>>) dst(%arg6 : memref<4x32xf32, #tpu.memory_space<vmem>>)
      %c0_22 = arith.constant 0 : index
      %c0_23 = arith.constant 0 : index
      %53 = vector.load %arg6[%c0_22, %c0_23] : memref<4x32xf32, #tpu.memory_space<vmem>>, vector<4x32xf32>
      %54 = arith.mulf %53, %53 : vector<4x32xf32>
      %cst_24 = arith.constant dense<0.000000e+00> : vector<4xf32>
      %55 = vector.multi_reduction <add>, %54, %cst_24 [1] : vector<4x32xf32> to vector<4xf32>
      %56 = vector.shape_cast %55 : vector<4xf32> to vector<4x1xf32>
      %cst_25 = arith.constant 1.000000e-24 : f32
      %57 = vector.broadcast %cst_25 : f32 to vector<4x1xf32>
      %58 = arith.maximumf %56, %57 : vector<4x1xf32>
      %59 = math.rsqrt %58 : vector<4x1xf32>
      %cst_26 = arith.constant 1.07250822 : f32
      %60 = vector.broadcast %cst_26 : f32 to vector<4x1xf32>
      %61 = arith.mulf %59, %60 : vector<4x1xf32>
      %62 = vector.broadcast %61 : vector<4x1xf32> to vector<4x32xf32>
      %63 = arith.mulf %53, %62 : vector<4x32xf32>
      %64 = arith.truncf %63 : vector<4x32xf32> to vector<4x32xbf16>
      %c0_27 = arith.constant 0 : index
      %c0_28 = arith.constant 0 : index
      %65 = vector.load %arg7[%c0_27, %c0_28] : memref<4x32xbf16, #tpu.memory_space<vmem>>, vector<4x32xbf16>
      tpu.vector_store %arg7[%c0_27, %c0_28], %64 {strides = array<i32>} : memref<4x32xbf16, #tpu.memory_space<vmem>>, vector<4x32xbf16>,
      %cst_29 = arith.constant 0.000000e+00 : f32
      %66 = vector.broadcast %cst_29 : f32 to vector<4x1xf32>
      %c0_30 = arith.constant 0 : index
      %c0_31 = arith.constant 0 : index
      %67 = vector.load %arg8[%c0_30, %c0_31] : memref<4x1xf32, #tpu.memory_space<vmem>>, vector<4x1xf32>
      tpu.vector_store %arg8[%c0_30, %c0_31], %66 {strides = array<i32>} : memref<4x1xf32, #tpu.memory_space<vmem>>, vector<4x1xf32>,
      %cst_32 = arith.constant 0.000000e+00 : f32
      %68 = vector.broadcast %cst_32 : f32 to vector<4x1xf32>
      %c0_33 = arith.constant 0 : index
      %c0_34 = arith.constant 0 : index
      %69 = vector.load %arg9[%c0_33, %c0_34] : memref<4x1xf32, #tpu.memory_space<vmem>>, vector<4x1xf32>
      tpu.vector_store %arg9[%c0_33, %c0_34], %68 {strides = array<i32>} : memref<4x1xf32, #tpu.memory_space<vmem>>, vector<4x1xf32>,
      %cst_35 = arith.constant 0.000000e+00 : f32
      %70 = vector.broadcast %cst_35 : f32 to vector<4x1xf32>
      %c0_36 = arith.constant 0 : index
      %c0_37 = arith.constant 0 : index
      %71 = vector.load %arg10[%c0_36, %c0_37] : memref<4x1xf32, #tpu.memory_space<vmem>>, vector<4x1xf32>
      tpu.vector_store %arg10[%c0_36, %c0_37], %70 {strides = array<i32>} : memref<4x1xf32, #tpu.memory_space<vmem>>, vector<4x1xf32>,
    } else {
    }
    %c0 = arith.constant 0 : index
    %c0_1 = arith.constant 0 : index
    %3 = vector.load %arg3[%c0, %c0_1] : memref<128x32xbf16, #tpu.memory_space<vmem>>, vector<128x32xbf16>
    %4 = arith.extf %3 : vector<128x32xbf16> to vector<128x32xf32>
    %5 = arith.mulf %4, %4 : vector<128x32xf32>
    %cst = arith.constant dense<0.000000e+00> : vector<128xf32>
    %6 = vector.multi_reduction <add>, %5, %cst [1] : vector<128x32xf32> to vector<128xf32>
    %7 = vector.shape_cast %6 : vector<128xf32> to vector<128x1xf32>
    %cst_2 = arith.constant 1.000000e-24 : f32
    %8 = vector.broadcast %cst_2 : f32 to vector<128x1xf32>
    %9 = arith.maximumf %7, %8 : vector<128x1xf32>
    %10 = math.rsqrt %9 : vector<128x1xf32>
    %11 = vector.broadcast %10 : vector<128x1xf32> to vector<128x32xf32>
    %12 = arith.mulf %4, %11 : vector<128x32xf32>
    %13 = arith.truncf %12 : vector<128x32xf32> to vector<128x32xbf16>
    %c0_3 = arith.constant 0 : index
    %c0_4 = arith.constant 0 : index
    %14 = vector.load %arg7[%c0_3, %c0_4] : memref<4x32xbf16, #tpu.memory_space<vmem>>, vector<4x32xbf16>
    %cst_5 = arith.constant dense<0.000000e+00> : vector<4x128xf32>
    %15 = tpu.matmul %14, %13, %cst_5 {dimension_numbers = #tpu.dot_dimension_numbers<[1], [1], [0], [0], [0, 0, 1, 0], [], []>} : vector<4x32xbf16>, vector<128x32xbf16>, vector<4x128xf32> -> vector<4x128xf32>
    %c1_i32 = arith.constant 1 : i32
    %16 = arith.muli %arg0, %c1_i32 : i32
    %17 = arith.addi %16, %arg1 : i32
    %c128_i32 = arith.constant 128 : i32
    %18 = arith.muli %17, %c128_i32 : i32
    %19 = tpu.iota {dimensions = array<i32: 0>} : vector<4x128xi32>
    %20 = tpu.iota {dimensions = array<i32: 1>} : vector<4x128xi32>
    %21 = vector.broadcast %18 : i32 to vector<4x128xi32>
    %22 = arith.addi %20, %21 : vector<4x128xi32>
    %c2_i32 = arith.constant 2 : i32
    %23 = vector.broadcast %c2_i32 : i32 to vector<4x128xi32>
    %24 = arith.muli %19, %23 : vector<4x128xi32>
    %25 = arith.subi %22, %24 : vector<4x128xi32>
    %c2_i32_6 = arith.constant 2 : i32
    %26 = vector.broadcast %c2_i32_6 : i32 to vector<4x128xi32>
    %27 = arith.cmpi ult, %25, %26 : vector<4x128xi32>
    %cst_7 = arith.constant 0.000000e+00 : f32
    %28 = vector.broadcast %cst_7 : f32 to vector<4x128xf32>
    %29 = arith.select %27, %15, %28 : vector<4x128xi1>, vector<4x128xf32>
    %c0_8 = arith.constant 0 : index
    %c0_9 = arith.constant 0 : index
    %30 = vector.load %arg10[%c0_8, %c0_9] : memref<4x1xf32, #tpu.memory_space<vmem>>, vector<4x1xf32>
    %cst_10 = arith.constant dense<0.000000e+00> : vector<4xf32>
    %31 = vector.multi_reduction <add>, %29, %cst_10 [1] : vector<4x128xf32> to vector<4xf32>
    %32 = vector.shape_cast %31 : vector<4xf32> to vector<4x1xf32>
    %33 = arith.addf %30, %32 : vector<4x1xf32>
    %c0_11 = arith.constant 0 : index
    %c0_12 = arith.constant 0 : index
    %34 = vector.load %arg10[%c0_11, %c0_12] : memref<4x1xf32, #tpu.memory_space<vmem>>, vector<4x1xf32>
    tpu.vector_store %arg10[%c0_11, %c0_12], %33 {strides = array<i32>} : memref<4x1xf32, #tpu.memory_space<vmem>>, vector<4x1xf32>,
    %cst_13 = arith.constant dense<0.000000e+00> : vector<128xf32>
    %35 = vector.multi_reduction <add>, %29, %cst_13 [0] : vector<4x128xf32> to vector<128xf32>
    %36 = vector.shape_cast %35 : vector<128xf32> to vector<1x128xf32>
    %c128_i32_14 = arith.constant 128 : i32
    %37 = arith.addi %18, %c128_i32_14 : i32
    %c8_i32 = arith.constant 8 : i32
    %38 = arith.cmpi sgt, %37, %c8_i32 : i32
    %39 = math.exp %15 : vector<4x128xf32>
    %40 = arith.extui %38 : i1 to i32
    %c0_i32_15 = arith.constant 0 : i32
    %41 = arith.cmpi ne, %40, %c0_i32_15 : i32
    scf.if %41 {
      %c0_22 = arith.constant 0 : index
      %c0_23 = arith.constant 0 : index
      %53 = vector.load %arg9[%c0_22, %c0_23] : memref<4x1xf32, #tpu.memory_space<vmem>>, vector<4x1xf32>
      %c8_i32_24 = arith.constant 8 : i32
      %54 = vector.broadcast %c8_i32_24 : i32 to vector<4x128xi32>
      %55 = arith.cmpi slt, %22, %54 : vector<4x128xi32>
      %cst_25 = arith.constant 0.000000e+00 : f32
      %56 = vector.broadcast %cst_25 : f32 to vector<4x128xf32>
      %57 = arith.select %55, %39, %56 : vector<4x128xi1>, vector<4x128xf32>
      %cst_26 = arith.constant dense<0.000000e+00> : vector<4xf32>
      %58 = vector.multi_reduction <add>, %57, %cst_26 [1] : vector<4x128xf32> to vector<4xf32>
      %59 = vector.shape_cast %58 : vector<4xf32> to vector<4x1xf32>
      %60 = arith.addf %53, %59 : vector<4x1xf32>
      %c0_27 = arith.constant 0 : index
      %c0_28 = arith.constant 0 : index
      %61 = vector.load %arg9[%c0_27, %c0_28] : memref<4x1xf32, #tpu.memory_space<vmem>>, vector<4x1xf32>
      tpu.vector_store %arg9[%c0_27, %c0_28], %60 {strides = array<i32>} : memref<4x1xf32, #tpu.memory_space<vmem>>, vector<4x1xf32>,
    } else {
    }
    %true = arith.constant true
    %42 = arith.xori %38, %true : i1
    %43 = arith.extui %42 : i1 to i32
    %c0_i32_16 = arith.constant 0 : i32
    %44 = arith.cmpi ne, %43, %c0_i32_16 : i32
    scf.if %44 {
      %c0_22 = arith.constant 0 : index
      %c0_23 = arith.constant 0 : index
      %53 = vector.load %arg9[%c0_22, %c0_23] : memref<4x1xf32, #tpu.memory_space<vmem>>, vector<4x1xf32>
      %cst_24 = arith.constant dense<0.000000e+00> : vector<4xf32>
      %54 = vector.multi_reduction <add>, %39, %cst_24 [1] : vector<4x128xf32> to vector<4xf32>
      %55 = vector.shape_cast %54 : vector<4xf32> to vector<4x1xf32>
      %56 = arith.addf %53, %55 : vector<4x1xf32>
      %c0_25 = arith.constant 0 : index
      %c0_26 = arith.constant 0 : index
      %57 = vector.load %arg9[%c0_25, %c0_26] : memref<4x1xf32, #tpu.memory_space<vmem>>, vector<4x1xf32>
      tpu.vector_store %arg9[%c0_25, %c0_26], %56 {strides = array<i32>} : memref<4x1xf32, #tpu.memory_space<vmem>>, vector<4x1xf32>,
    } else {
    }
    %cst_17 = arith.constant dense<0.000000e+00> : vector<128xf32>
    %45 = vector.multi_reduction <add>, %39, %cst_17 [0] : vector<4x128xf32> to vector<128xf32>
    %46 = vector.shape_cast %45 : vector<128xf32> to vector<1x128xf32>
    %47 = math.log %46 : vector<1x128xf32>
    %48 = arith.subf %47, %36 : vector<1x128xf32>
    %c0_18 = arith.constant 0 : index
    %c0_19 = arith.constant 0 : index
    %49 = vector.load %arg4[%c0_18, %c0_19] : memref<1x128xf32, #tpu.memory_space<vmem>>, vector<1x128xf32>
    tpu.vector_store %arg4[%c0_18, %c0_19], %48 {strides = array<i32>} : memref<1x128xf32, #tpu.memory_space<vmem>>, vector<1x128xf32>,
    %c0_i32_20 = arith.constant 0 : i32
    %50 = arith.cmpi eq, %arg1, %c0_i32_20 : i32
    %51 = arith.extui %50 : i1 to i32
    %c0_i32_21 = arith.constant 0 : i32
    %52 = arith.cmpi ne, %51, %c0_i32_21 : i32
    scf.if %52 {
      %53 = tpu.iota {dimensions = array<i32: 1>} : vector<4x128xi32>
      %c0_i32_22 = arith.constant 0 : i32
      %54 = vector.broadcast %c0_i32_22 : i32 to vector<4x128xi32>
      %55 = arith.cmpi eq, %53, %54 : vector<4x128xi32>
      %c0_23 = arith.constant 0 : index
      %c0_24 = arith.constant 0 : index
      %56 = vector.load %arg8[%c0_23, %c0_24] : memref<4x1xf32, #tpu.memory_space<vmem>>, vector<4x1xf32>
      %c1_i32_25 = arith.constant 1 : i32
      %57 = vector.broadcast %c1_i32_25 : i32 to vector<4x128xi32>
      %58 = arith.cmpi eq, %53, %57 : vector<4x128xi32>
      %c0_26 = arith.constant 0 : index
      %c0_27 = arith.constant 0 : index
      %59 = vector.load %arg9[%c0_26, %c0_27] : memref<4x1xf32, #tpu.memory_space<vmem>>, vector<4x1xf32>
      %c0_28 = arith.constant 0 : index
      %c0_29 = arith.constant 0 : index
      %60 = vector.load %arg10[%c0_28, %c0_29] : memref<4x1xf32, #tpu.memory_space<vmem>>, vector<4x1xf32>
      %61 = vector.shape_cast %59 : vector<4x1xf32> to vector<4x1xf32>
      %62 = vector.broadcast %61 : vector<4x1xf32> to vector<4x128xf32>
      %63 = vector.shape_cast %60 : vector<4x1xf32> to vector<4x1xf32>
      %64 = vector.broadcast %63 : vector<4x1xf32> to vector<4x128xf32>
      %65 = arith.select %58, %62, %64 : vector<4x128xi1>, vector<4x128xf32>
      %66 = vector.shape_cast %56 : vector<4x1xf32> to vector<4x1xf32>
      %67 = vector.broadcast %66 : vector<4x1xf32> to vector<4x128xf32>
      %68 = arith.select %55, %67, %65 : vector<4x128xi1>, vector<4x128xf32>
      %c0_30 = arith.constant 0 : index
      %c0_31 = arith.constant 0 : index
      %69 = vector.load %arg5[%c0_30, %c0_31] : memref<4x128xf32, #tpu.memory_space<vmem>>, vector<4x128xf32>
      tpu.vector_store %arg5[%c0_30, %c0_31], %68 {strides = array<i32>} : memref<4x128xf32, #tpu.memory_space<vmem>>, vector<4x128xf32>,
    } else {
    }
    return
  }
  func.func @transform_1(%arg0: i32, %arg1: i32) -> (i32, i32) {
    %c1_i32 = arith.constant 1 : i32
    %0 = arith.muli %arg0, %c1_i32 : i32
    %1 = arith.addi %0, %arg1 : i32
    %c0_i32 = arith.constant 0 : i32
    %c0_i32_0 = arith.constant 0 : i32
    return %1, %c0_i32 : i32, i32
  }
  func.func @transform_2(%arg0: i32, %arg1: i32) -> (i32, i32) {
    %c1_i32 = arith.constant 1 : i32
    %0 = arith.muli %arg0, %c1_i32 : i32
    %1 = arith.addi %0, %arg1 : i32
    %c0_i32 = arith.constant 0 : i32
    %c0_i32_0 = arith.constant 0 : i32
    return %c0_i32, %1 : i32, i32
  }
  func.func @transform_3(%arg0: i32, %arg1: i32) -> (i32, i32) {
    %c0_i32 = arith.constant 0 : i32
    %c0_i32_0 = arith.constant 0 : i32
    return %c0_i32, %arg0 : i32, i32
  }
}

</mosaic_0001>

<bundles_post_ra>
// kernel: tpu_custom_call.1
= control target key start
LH: loop header
LB: loop body
LE: loop exit
PB: predicated region body
PF: predicated region fallthrough
CT: control target
= control target key end

     0   :  { %9 = vsyncpa [#allocation9], 0  ;;  %s1194_s0 = inlined_call_operand.vmem [shape: f32[4,32], index: 0, kind: input, shape index: {}]   ;;  %s1195_s1 = inlined_call_operand.vmem [shape: bf16[128,32], index: 1, kind: input, shape index: {}]   ;;  %s1196_s2 = inlined_call_operand.hbm [shape: f32[1,128], index: 2, kind: output, shape index: {0}]   ;;  %s1197_s3 = inlined_call_operand.hbm [shape: f32[4,128], index: 3, kind: output, shape index: {1}]  }
   0x1   :  { %10 = vsyncpa [#allocation11], 0  ;;  %v54_v0 = vld [vmem:[%s1194_s0] sm:$0xf] }
   0x2   :  { %55 = vst [vmem:[#allocation2] sm:$0xf] %v54_v0 }
   0x3   :  { %73 = vsyncadd [#allocation7], 64 }
   0x4   :  { %716 = dma.done.wait [#allocation7], 64 }
   0x5   :  { %717 = vsyncadd [#allocation7], 4294967232  ;;  %v622_v1 = vld [vmem:[%s1195_s1 + $0x38] sm:$0xff]   ;;  %v621_v2 = vld [vmem:[%s1195_s1 + $0x30] sm:$0xff]   ;;  %vm151_vm0 = vcmask 261120   ;;  %vm79_vm1 = vcmask 257024  }
   0x6   :  { %v620_v3 = vld [vmem:[%s1195_s1 + $0x28] sm:$0xff]   ;;  %v758_v4 = vunpack.c.l.bf16 %v622_v1  ;;  %v760_v5 = vunpack.c.l.bf16 %v621_v2  ;;  %v764_v7 = vunpack.c.h.bf16 %v622_v1  ;;  %v772_v11 = vunpack.c.h.bf16 %v621_v2  ;;  %v619_v19 = vld [vmem:[%s1195_s1 + $0x20] sm:$0xff]   ;;  %v618_v20 = vld [vmem:[%s1195_s1 + $0x18] sm:$0xff]   ;;  %s540_s30 = sshll.u32 %s1196_s2, 4  ;;  %s724_s4 = smov [#allocation8]   ;;  %s541_s30 = int_to_ptr.hbm [resolvable:$true] %s540_s30 }
   0x7   :  { %v762_v6 = vunpack.c.l.bf16 %v620_v3  ;;  %v774_v12 = vunpack.c.h.bf16 %v620_v3  ;;  %v793_v23 = vunpack.c.h.bf16 %v619_v19  ;;  %v795_v24 = vunpack.c.l.bf16 %v619_v19  ;;  %v617_v30 = vld [vmem:[%s1195_s1 + $0x10] sm:$0xff]   ;;  %v616_v40 = vld [vmem:[%s1195_s1 + $0x8] sm:$0xff]   ;;  %v585_v50 = vld [vmem:[%s1195_s1] sm:$0xff]   ;;  %s538_s5 = sshll.u32 %s724_s4, 4  ;;  %s725_s6 = smov [#allocation10]   ;;  %s539_s5 = int_to_ptr.vmem [resolvable:$true] %s538_s5 }
   0x8   :  { %v149_v8 = vmul.f32 %v758_v4, %v758_v4  ;;  %v147_v9 = vmul.f32 %v760_v5, %v760_v5  ;;  %v150_v16 = vmul.f32 %v764_v7, %v764_v7  ;;  %v148_v17 = vmul.f32 %v772_v11, %v772_v11  ;;  %s549_s7 = sshll.u32 %s725_s6, 4  ;;  %s551_s2 = sshll.u32 %s1197_s3, 4  ;;  %s550_s7 = int_to_ptr.vmem [resolvable:$true] %s549_s7  ;;  %s552_s2 = int_to_ptr.hbm [resolvable:$true] %s551_s2 }
   0x9   :  { %v145_v10 = vmul.f32 %v762_v6, %v762_v6  ;;  %v146_v18 = vmul.f32 %v774_v12, %v774_v12  ;;  %v798_v26 = vunpack.c.l.bf16 %v618_v20  ;;  %v144_v27 = vmul.f32 %v793_v23, %v793_v23  ;;  %v834_v46 = vld [vmem:[#allocation2] sm:$0xf] }
   0xa   :  { %v194_v13 = vsel %vm151_vm0, %v149_v8, 0.0  ;;  %v188_v14 = vsel %vm151_vm0, %v147_v9, 0.0  ;;  %v197_v21 = vsel %vm151_vm0, %v150_v16, 0.0  ;;  %v191_v22 = vsel %vm151_vm0, %v148_v17, 0.0 }
   0xb   :  { %v182_v15 = vsel %vm151_vm0, %v145_v10, 0.0  ;;  %195 = vadd.xlane.f32.xlu0 %v194_v13  ;;  %189 = vadd.xlane.f32.xlu1 %v188_v14  ;;  %v185_v25 = vsel %vm151_vm0, %v146_v18, 0.0  ;;  %v143_v28 = vmul.f32 %v795_v24, %v795_v24  ;;  %v141_v29 = vmul.f32 %v798_v26, %v798_v26 }
   0xc   :  { %183 = vadd.xlane.f32.xlu2 %v182_v15  ;;  %v179_v31 = vsel %vm151_vm0, %v144_v27, 0.0  ;;  %v811_v33 = vunpack.c.h.bf16 %v618_v20  ;;  %v813_v34 = vunpack.c.l.bf16 %v617_v30  ;;  %v816_v36 = vunpack.c.h.bf16 %v617_v30 }
   0xd   :  { %v176_v32 = vsel %vm151_vm0, %v143_v28, 0.0  ;;  %v170_v35 = vsel %vm151_vm0, %v141_v29, 0.0  ;;  %v829_v43 = vunpack.c.h.bf16 %v616_v40  ;;  %v831_v44 = vunpack.c.l.bf16 %v616_v40 }
   0xe   :  { %v142_v37 = vmul.f32 %v811_v33, %v811_v33  ;;  %v139_v38 = vmul.f32 %v813_v34, %v813_v34  ;;  %v140_v39 = vmul.f32 %v816_v36, %v816_v36  ;;  %v78_v49 = vmul.f32 %v834_v46, %v834_v46 }
   0xf   :  { %v138_v47 = vmul.f32 %v829_v43, %v829_v43  ;;  %v137_v48 = vmul.f32 %v831_v44, %v831_v44  ;;  %v847_v53 = vunpack.c.h.bf16 %v585_v50  ;;  %v849_v54 = vunpack.c.l.bf16 %v585_v50 }
  0x10   :  { %v173_v41 = vsel %vm151_vm0, %v142_v37, 0.0  ;;  %v164_v42 = vsel %vm151_vm0, %v139_v38, 0.0  ;;  %v167_v45 = vsel %vm151_vm0, %v140_v39, 0.0  ;;  %v80_v55 = vsel %vm79_vm1, %v78_v49, 0.0 }
  0x11   :  { %v161_v51 = vsel %vm151_vm0, %v138_v47, 0.0  ;;  %v158_v52 = vsel %vm151_vm0, %v137_v48, 0.0  ;;  %v136_v56 = vmul.f32 %v847_v53, %v847_v53  ;;  %v135_v57 = vmul.f32 %v849_v54, %v849_v54 }
  0x13   :  { %198 = vadd.xlane.f32.xlu0 %v197_v21  ;;  %192 = vadd.xlane.f32.xlu1 %v191_v22  ;;  %v155_v58 = vsel %vm151_vm0, %v136_v56, 0.0  ;;  %v152_v59 = vsel %vm151_vm0, %v135_v57, 0.0 }
  0x14   :  { %186 = vadd.xlane.f32.xlu2 %v185_v25 }
  0x1b   :  { %180 = vadd.xlane.f32.xlu1 %v179_v31  ;;  %177 = vadd.xlane.f32.xlu0 %v176_v32 }
  0x1c   :  { %171 = vadd.xlane.f32.xlu2 %v170_v35 }
  0x23   :  { %174 = vadd.xlane.f32.xlu0 %v173_v41  ;;  %165 = vadd.xlane.f32.xlu1 %v164_v42 }
  0x24   :  { %168 = vadd.xlane.f32.xlu2 %v167_v45 }
  0x2b   :  { %162 = vadd.xlane.f32.xlu1 %v161_v51  ;;  %159 = vadd.xlane.f32.xlu0 %v158_v52 }
  0x2c   :  { %81 = vadd.xlane.f32.xlu2 %v80_v55 }
  0x33   :  { %156 = vadd.xlane.f32.xlu1 %v155_v58  ;;  %153 = vadd.xlane.f32.xlu0 %v152_v59 }
  0x7e   :  { %v196_v60 = vpop.xlane.xlu0 %195  ;;  %v190_v61 = vpop.xlane.xlu1 %189 }
  0x7f   :  { %v857_v62 = vmax.f32 %v196_v60, 1e-24  ;;  %v184_v63 = vpop.xlane.xlu2 %183  ;;  %v860_v0 = vmax.f32 %v190_v61, 1e-24 }
  0x80   :  { %v871_v14 = vmax.f32 %v184_v63, 1e-24 }
  0x81   :  { %630 = vrsqrt.f32 %v857_v62  ;;  %vm362_vm3 = vweird.f32 %v857_v62  ;;  %vm342_vm9 = vweird.f32 %v860_v0 }
  0x82   :  { %632 = vrsqrt.f32 %v860_v0  ;;  %vm322_vm13 = vweird.f32 %v871_v14 }
  0x86   :  { %v199_v1 = vpop.xlane.xlu0 %198  ;;  %v193_v2 = vpop.xlane.xlu1 %192 }
  0x87   :  { %v863_v3 = vpop.eup %630  ;;  %v865_v8 = vmax.f32 %v199_v1, 1e-24  ;;  %v867_v9 = vmax.f32 %v193_v2, 1e-24  ;;  %v187_v10 = vpop.xlane.xlu2 %186 }
  0x88   :  { %v357_v13 = vmul.f32 %v863_v3, %v857_v62  ;;  %v873_v15 = vmax.f32 %v187_v10, 1e-24  ;;  %v877_v16 = vpop.eup %632  ;;  %vm363_vm2 = vweird.f32 %v863_v3 }
  0x89   :  { %634 = vrsqrt.f32 %v865_v8  ;;  %v337_v18 = vmul.f32 %v877_v16, %v860_v0  ;;  %vm372_vm4 = vweird.f32 %v865_v8  ;;  %vm352_vm6 = vweird.f32 %v867_v9  ;;  %vm928_vm7 = vmor %vm362_vm3, %vm363_vm2 }
  0x8a   :  { %636 = vrsqrt.f32 %v867_v9  ;;  %v358_v17 = vmul.f32 %v863_v3, %v357_v13  ;;  %vm343_vm11 = vweird.f32 %v877_v16  ;;  %vm332_vm1 = vweird.f32 %v873_v15 }
  0x8b   :  { %638 = vrsqrt.f32 %v873_v15  ;;  %v338_v37 = vmul.f32 %v877_v16, %v337_v18  ;;  %vm976_vm15 = vmor %vm342_vm9, %vm343_vm11 }
  0x8c   :  { %640 = vrsqrt.f32 %v871_v14  ;;  %v359_v29 = vmul.f32 0.5, %v358_v17 }
  0x8d   :  { %v339_v49 = vmul.f32 0.5, %v338_v37 }
  0x8e   :  { %v181_v19 = vpop.xlane.xlu1 %180  ;;  %v178_v20 = vpop.xlane.xlu0 %177  ;;  %v360_v40 = vsub.f32 1.5, %v359_v29 }
  0x8f   :  { %v884_v21 = vpop.eup %634  ;;  %v886_v22 = vmax.f32 %v181_v19, 1e-24  ;;  %v888_v25 = vmax.f32 %v178_v20, 1e-24  ;;  %v172_v27 = vpop.xlane.xlu2 %171  ;;  %v340_v1 = vsub.f32 1.5, %v339_v49 }
  0x90   :  { %v890_v28 = vpop.eup %636  ;;  %v367_v30 = vmul.f32 %v884_v21, %v865_v8  ;;  %v909_v48 = vmax.f32 %v172_v27, 1e-24  ;;  %v361_v60 = vmul.f32 %v863_v3, %v360_v40  ;;  %vm373_vm5 = vweird.f32 %v884_v21 }
  0x91   :  { %v894_v31 = vpop.eup %638  ;;  %v347_v32 = vmul.f32 %v890_v28, %v867_v9  ;;  %642 = vrsqrt.f32 %v886_v22  ;;  %vm353_vm8 = vweird.f32 %v890_v28  ;;  %vm374_vm10 = vmor %vm372_vm4, %vm373_vm5  ;;  %vm312_vm5 = vweird.f32 %v886_v22 }
  0x92   :  { %v899_v35 = vpop.eup %640  ;;  %v368_v38 = vmul.f32 %v884_v21, %v367_v30  ;;  %644 = vrsqrt.f32 %v888_v25  ;;  %v327_v42 = vmul.f32 %v894_v31, %v873_v15  ;;  %v365_v13 = vsel %vm928_vm7, %v863_v3, %v361_v60  ;;  %vm957_vm12 = vmor %vm352_vm6, %vm353_vm8 }
  0x93   :  { %v348_v39 = vmul.f32 %v890_v28, %v347_v32  ;;  %v317_v45 = vmul.f32 %v899_v35, %v871_v14  ;;  %646 = vrsqrt.f32 %v909_v48  ;;  %v341_v30 = vmul.f32 %v877_v16, %v340_v1 }
  0x94   :  { %v369_v41 = vmul.f32 0.5, %v368_v38  ;;  %v328_v59 = vmul.f32 %v894_v31, %v327_v42  ;;  %vm323_vm14 = vweird.f32 %v899_v35  ;;  %vm333_vm2 = vweird.f32 %v894_v31 }
  0x95   :  { %v349_v47 = vmul.f32 0.5, %v348_v39  ;;  %v318_v61 = vmul.f32 %v899_v35, %v317_v45  ;;  %v390_v39 = vmul.f32 %v758_v4, %v365_v13  ;;  %v345_v0 = vsel %vm976_vm15, %v877_v16, %v341_v30  ;;  %vm1000_vm3 = vmor %vm332_vm1, %vm333_vm2 }
  0x96   :  { %v175_v50 = vpop.xlane.xlu0 %174  ;;  %v166_v51 = vpop.xlane.xlu1 %165  ;;  %v370_v57 = vsub.f32 1.5, %v369_v41  ;;  %v329_v8 = vmul.f32 0.5, %v328_v59  ;;  %vm1015_vm4 = vmor %vm322_vm13, %vm323_vm14  ;;  %vm302_vm7 = vweird.f32 %v888_v25  ;;  %vm282_vm11 = vweird.f32 %v909_v48 }
  0x97   :  { %v911_v52 = vpop.eup %642  ;;  %v914_v55 = vmax.f32 %v175_v50, 1e-24  ;;  %v350_v58 = vsub.f32 1.5, %v349_v47  ;;  %v169_v63 = vpop.xlane.xlu2 %168  ;;  %v319_v19 = vmul.f32 0.5, %v318_v61  ;;  %v944_v20 = vmax.f32 %v166_v51, 1e-24 }
  0x98   :  { %v916_v56 = vpop.eup %644  ;;  %v307_v62 = vmul.f32 %v911_v52, %v886_v22  ;;  %v371_v17 = vmul.f32 %v884_v21, %v370_v57  ;;  %v947_v27 = vmax.f32 %v169_v63, 1e-24  ;;  %v330_v40 = vsub.f32 1.5, %v329_v8 }
  0x99   :  { %v297_v10 = vmul.f32 %v916_v56, %v888_v25  ;;  %648 = vrsqrt.f32 %v914_v55  ;;  %v351_v18 = vmul.f32 %v890_v28, %v350_v58  ;;  %v951_v32 = vpop.eup %646  ;;  %vm313_vm6 = vweird.f32 %v911_v52 }
  0x9a   :  { %v375_v29 = vsel %vm374_vm10, %v884_v21, %v371_v17  ;;  %v308_v37 = vmul.f32 %v911_v52, %v307_v62  ;;  %650 = vrsqrt.f32 %v944_v20  ;;  %v331_v63 = vmul.f32 %v894_v31, %v330_v40  ;;  %vm1039_vm9 = vmor %vm312_vm5, %vm313_vm6 }
  0x9b   :  { %v298_v38 = vmul.f32 %v916_v56, %v297_v10  ;;  %v391_v21 = vmul.f32 %v764_v7, %v375_v29  ;;  %v355_v9 = vsel %vm957_vm12, %v890_v28, %v351_v18  ;;  %v320_v7 = vsub.f32 1.5, %v319_v19 }
  0x9c   :  { %v277_v28 = vmul.f32 %v951_v32, %v909_v48  ;;  %652 = vrsqrt.f32 %v947_v27  ;;  %v309_v50 = vmul.f32 0.5, %v308_v37  ;;  %v389_v58 = vmul.f32 %v772_v11, %v355_v9 }
  0x9d   :  { %v399_v45 = vpack.c.bf16 %v391_v21, %v390_v39  ;;  %v299_v51 = vmul.f32 0.5, %v298_v38  ;;  %v388_v11 = vmul.f32 %v760_v5, %v345_v0  ;;  %v321_v2 = vmul.f32 %v899_v35, %v320_v7 }
  0x9e   :  { %v163_v41 = vpop.xlane.xlu1 %162  ;;  %v160_v47 = vpop.xlane.xlu0 %159  ;;  %v310_v10 = vsub.f32 1.5, %v309_v50  ;;  %v278_v8 = vmul.f32 %v951_v32, %v277_v28  ;;  %v335_v19 = vsel %vm1000_vm3, %v894_v31, %v331_v63  ;;  %vm303_vm8 = vweird.f32 %v916_v56 }
  0x9f   :  { %v970_v42 = vpop.eup %648  ;;  %v82_v49 = vpop.xlane.xlu2 %81  ;;  %v426_v57 = vsel %vm151_vm0, %v399_v45, 0  ;;  %v993_v60 = vmax.f32 %v163_v41, 1e-24  ;;  %v1004_v1 = vmax.f32 %v160_v47, 1e-24  ;;  %v398_v13 = vpack.c.bf16 %v389_v58, %v388_v11  ;;  %vm1051_vm10 = vmor %vm302_vm7, %vm303_vm8 }
  0xa0   :  { %v287_v59 = vmul.f32 %v970_v42, %v914_v55  ;;  %428 = vmatpush.bf16.xpose.msra.mxu0 %v426_v57  ;;  %v995_v61 = vmax.f32 %v82_v49, 1e-24  ;;  %v1009_v62 = vpop.eup %650  ;;  %v300_v5 = vsub.f32 1.5, %v299_v51  ;;  %v325_v30 = vsel %vm1015_vm4, %v899_v35, %v321_v2 }
  0xa1   :  { %v257_v14 = vmul.f32 %v1009_v62, %v944_v20  ;;  %v279_v3 = vmul.f32 0.5, %v278_v8  ;;  %v423_v31 = vsel %vm151_vm0, %v398_v13, 0  ;;  %v387_v37 = vmul.f32 %v774_v12, %v335_v19 }
  0xa2   :  { %654 = vrsqrt.f32 %v995_v61  ;;  %v1020_v17 = vpop.eup %652  ;;  %v288_v18 = vmul.f32 %v970_v42, %v287_v59  ;;  %v301_v41 = vmul.f32 %v916_v56, %v300_v5  ;;  %v311_v35 = vmul.f32 %v911_v52, %v310_v10 }
  0xa3   :  { %656 = vrsqrt.f32 %v993_v60  ;;  %v267_v40 = vmul.f32 %v1020_v17, %v947_v27  ;;  %v386_v7 = vmul.f32 %v762_v6, %v325_v30  ;;  %vm292_vm12 = vweird.f32 %v914_v55 }
  0xa4   :  { %658 = vrsqrt.f32 %v1004_v1  ;;  %v289_v21 = vmul.f32 0.5, %v288_v18  ;;  %vm283_vm13 = vweird.f32 %v951_v32  ;;  %v258_v25 = vmul.f32 %v1009_v62, %v257_v14 }
  0xa5   :  { %vm293_vm14 = vweird.f32 %v970_v42  ;;  %v280_v28 = vsub.f32 1.5, %v279_v3  ;;  %v397_v50 = vpack.c.bf16 %v387_v37, %v386_v7  ;;  %v268_v6 = vmul.f32 %v1020_v17, %v267_v40  ;;  %vm1088_vm2 = vmor %vm282_vm11, %vm283_vm13 }
  0xa6   :  { %v157_v29 = vpop.xlane.xlu1 %156  ;;  %v154_v22 = vpop.xlane.xlu0 %153  ;;  %v290_v51 = vsub.f32 1.5, %v289_v21  ;;  %v305_v57 = vsel %vm1051_vm10, %v916_v56, %v301_v41  ;;  %v315_v58 = vsel %vm1039_vm9, %v911_v52, %v311_v35  ;;  %vm90_vm15 = vweird.f32 %v995_v61  ;;  %vm1101_vm4 = vmor %vm292_vm12, %vm293_vm14 }
  0xa7   :  { %v1057_v4 = vmax.f32 %v157_v29, 1e-24  ;;  %v1065_v47 = vmax.f32 %v154_v22, 1e-24  ;;  %v259_v63 = vmul.f32 0.5, %v258_v25  ;;  %v384_v2 = vmul.f32 %v795_v24, %v305_v57 }
  0xa8   :  { %v655_v38 = vpop.eup %654  ;;  %429 = vmatpush.bf16.xpose.msra.mxu0 %v423_v31  ;;  %v385_v15 = vmul.f32 %v793_v23, %v315_v58  ;;  %v269_v10 = vmul.f32 0.5, %v268_v6  ;;  %v281_v8 = vmul.f32 %v951_v32, %v280_v28  ;;  %v291_v13 = vmul.f32 %v970_v42, %v290_v51 }
  0xa9   :  { %v85_v9 = vmul.f32 %v655_v38, %v995_v61  ;;  %v1060_v45 = vpop.eup %656  ;;  %vm91_vm1 = vweird.f32 %v655_v38  ;;  %660 = vrsqrt.f32 %v1057_v4  ;;  %v420_v61 = vsel %vm151_vm0, %v397_v50, 0 }
  0xaa   :  { %v1067_v49 = vpop.eup %658  ;;  %v247_v16 = vmul.f32 %v1060_v45, %v993_v60  ;;  %662 = vrsqrt.f32 %v1065_v47  ;;  %vm92_vm3 = vmor %vm90_vm15, %vm91_vm1  ;;  %v260_v18 = vsub.f32 1.5, %v259_v63  ;;  %v396_v29 = vpack.c.bf16 %v385_v15, %v384_v2 }
  0xab   :  { %v86_v0 = vmul.f32 %v655_v38, %v85_v9  ;;  %v237_v11 = vmul.f32 %v1067_v49, %v1004_v1  ;;  %v270_v3 = vsub.f32 1.5, %v269_v10  ;;  %v285_v55 = vsel %vm1088_vm2, %v951_v32, %v281_v8 }
  0xac   :  { %v248_v24 = vmul.f32 %v1060_v45, %v247_v16  ;;  %v295_v22 = vsel %vm1101_vm4, %v970_v42, %v291_v13  ;;  %vm272_vm5 = vweird.f32 %v947_v27  ;;  %vm262_vm6 = vweird.f32 %v944_v20 }
  0xad   :  { %v87_v59 = vmul.f32 0.5, %v86_v0  ;;  %v238_v19 = vmul.f32 %v1067_v49, %v237_v11  ;;  %vm263_vm7 = vweird.f32 %v1009_v62  ;;  %vm97_vm8 = vcmask 254976  }
  0xae   :  { %vm273_vm9 = vweird.f32 %v1020_v17  ;;  %v249_v37 = vmul.f32 0.5, %v248_v24  ;;  %v261_v39 = vmul.f32 %v1009_v62, %v260_v18  ;;  %v417_v32 = vsel %vm151_vm0, %v396_v29, 0  ;;  %vm1126_vm10 = vmor %vm262_vm6, %vm263_vm7 }
  0xaf   :  { %v88_v56 = vsub.f32 1.5, %v87_v59  ;;  %v1106_v23 = vpop.eup %660  ;;  %v239_v21 = vmul.f32 0.5, %v238_v19  ;;  %v382_v40 = vmul.f32 %v798_v26, %v285_v55  ;;  %v383_v42 = vmul.f32 %v811_v33, %v295_v22  ;;  %vm274_vm11 = vmor %vm272_vm5, %vm273_vm9 }
  0xb0   :  { %430 = vmatpush.bf16.xpose.msra.mxu0 %v420_v61  ;;  %v1109_v30 = vpop.eup %662  ;;  %v227_v35 = vmul.f32 %v1106_v23, %v1057_v4  ;;  %v271_v12 = vmul.f32 %v1020_v17, %v270_v3  ;;  %v250_v26 = vsub.f32 1.5, %v249_v37  ;;  %v265_v9 = vsel %vm1126_vm10, %v1009_v62, %v261_v39 }
  0xb1   :  { %v89_v5 = vmul.f32 %v655_v38, %v88_v56  ;;  %v395_v33 = vpack.c.bf16 %v383_v42, %v382_v40  ;;  %v240_v7 = vsub.f32 1.5, %v239_v21  ;;  %vm252_vm12 = vweird.f32 %v993_v60 }
  0xb2   :  { %v228_v25 = vmul.f32 %v1106_v23, %v227_v35  ;;  %v275_v0 = vsel %vm274_vm11, %v1020_v17, %v271_v12  ;;  %vm253_vm13 = vweird.f32 %v1060_v45  ;;  %vm242_vm14 = vweird.f32 %v1004_v1 }
  0xb3   :  { %v93_v14 = vsel %vm92_vm3, %v655_v38, %v89_v5  ;;  %vm243_vm15 = vweird.f32 %v1067_v49  ;;  %v414_v27 = vsel %vm151_vm0, %v395_v33, 0  ;;  %v380_v50 = vmul.f32 %v813_v34, %v265_v9  ;;  %vm1151_vm1 = vmor %vm252_vm12, %vm253_vm13 }
  0xb4   :  { %v94_v31 = vmul.f32 1.0725082, %v93_v14  ;;  %v381_v62 = vmul.f32 %v816_v36, %v275_v0  ;;  %v229_v6 = vmul.f32 0.5, %v228_v25  ;;  %v241_v60 = vmul.f32 %v1067_v49, %v240_v7  ;;  %vm244_vm2 = vmor %vm242_vm14, %vm243_vm15 }
  0xb5   :  { %v251_v57 = vmul.f32 %v1060_v45, %v250_v26  ;;  %vm232_vm3 = vweird.f32 %v1057_v4  ;;  %vm233_vm4 = vweird.f32 %v1106_v23  ;;  %vm222_vm5 = vweird.f32 %v1065_v47 }
  0xb6   :  { %v95_v38 = vmul.f32 %v94_v31, %v834_v46  ;;  %v217_v46 = vmul.f32 %v1109_v30, %v1065_v47  ;;  %v394_v1 = vpack.c.bf16 %v381_v62, %v380_v50  ;;  %v230_v58 = vsub.f32 1.5, %v229_v6  ;;  %vm234_vm7 = vmor %vm232_vm3, %vm233_vm4 }
  0xb7   :  { %v245_v63 = vsel %vm244_vm2, %v1067_v49, %v241_v60  ;;  %v255_v34 = vsel %vm1151_vm1, %v1060_v45, %v251_v57  ;;  %vm223_vm6 = vweird.f32 %v1109_v30  ;;  %v443_v10 = vlaneseq }
  0xb8   :  { %v96_v20 = vpack.c.bf16 %v95_v38, %v95_v38  ;;  %431 = vmatpush.bf16.xpose.msra.mxu0 %v417_v32  ;;  %v218_v28 = vmul.f32 %v1109_v30, %v217_v46  ;;  %v411_v36 = vsel %vm151_vm0, %v394_v1, 0  ;;  %v378_v16 = vmul.f32 %v831_v44, %v245_v63 }
  0xb9   :  { %v379_v11 = vmul.f32 %v829_v43, %v255_v34  ;;  %v231_v45 = vmul.f32 %v1106_v23, %v230_v58  ;;  %v444_v8 = vshrl.u32 %v443_v10, 7  ;;  %v1177_v13 = vand.u32 127, %v443_v10 }
  0xba   :  { %98 = vst.msk [vmem:[#allocation3] sm:$0x3] %vm97_vm8, %v96_v20  ;;  %v219_v17 = vmul.f32 0.5, %v218_v28  ;;  %vm224_vm8 = vmor %vm222_vm5, %vm223_vm6  ;;  %vm99_vm9 = vcmask 3072   ;;  %v722_v5 = vmov 0.0   ;;  %vm456_vm11 = vcmask 1043456  }
  0xbb   :  { %v393_v4 = vpack.c.bf16 %v379_v11, %v378_v16  ;;  %v235_v47 = vsel %vm234_vm7, %v1106_v23, %v231_v45  ;;  %v449_v48 = vmul.u32 2, %v444_v8  ;;  %100 = vst.msk [vmem:[#allocation4] sm:$0xf] %vm99_vm9, %v722_v5  ;;  %v723_v33 = vmov 0  }
  0xbc   :  { %v220_v59 = vsub.f32 1.5, %v219_v17  ;;  %v377_v44 = vmul.f32 %v847_v53, %v235_v47  ;;  %102 = vst.msk [vmem:[#allocation6] sm:$0xf] %vm99_vm9, %v722_v5  ;;  %628 = vset.pattern.permute.xlu2 %v723_v33  ;;  %627 = vset.pattern.permute.xlu1 %v723_v33  ;;  %vm510_vm12 = vcmp.eq.s32.totalorder %v1177_v13, 1  ;;  %vm508_vm13 = vcmp.eq.s32.totalorder %v1177_v13, 0 }
  0xbd   :  { %v408_v56 = vsel %vm151_vm0, %v393_v4, 0  ;;  %v450_v53 = vsub.s32 %v1177_v13, %v449_v48  ;;  %101 = vst.msk [vmem:[#allocation5] sm:$0xf] %vm99_vm9, %v722_v5  ;;  %629 = vset.pattern.permute.xlu0 %v723_v33 }
  0xbe   :  { %v221_v49 = vmul.f32 %v1109_v30, %v220_v59 }
  0xc0   :  { %432 = vmatpush.bf16.xpose.msra.mxu0 %v414_v27  ;;  %v225_v52 = vsel %vm224_vm8, %v1109_v30, %v221_v49 }
  0xc1   :  { %v376_v61 = vmul.f32 %v849_v54, %v225_v52  ;;  %v400_v15 = vld [vmem:[#allocation3] sm:$0x3]  ;;  %v582_v54 = vxor.u32 2147483648, %v450_v53 }
  0xc2   :  { %v509_v9 = vld [vmem:[#allocation4] sm:$0xf] }
  0xc3   :  { %v392_v43 = vpack.c.bf16 %v377_v44, %v376_v61  ;;  %vm453_vm10 = vcmp.lt.s32.totalorder %v582_v54, 2147483650  ;;  %v455_v7 = vld [vmem:[#allocation6] sm:$0xf] }
  0xc4   :  { %v476_v0 = vld [vmem:[#allocation5] sm:$0xf] }
  0xc5   :  { %v405_v2 = vsel %vm151_vm0, %v392_v43, 0 }
  0xc8   :  { %433 = vmatpush.bf16.xpose.msra.mxu0 %v411_v36 }
  0xd0   :  { %434 = vmatpush.bf16.xpose.msra.mxu0 %v408_v56 }
  0xd8   :  { %435 = vmatpush.bf16.xpose.msra.mxu0 %v405_v2 }
  0xdf   :  { %581 = vmatmul.msk.bf16.vlgmr.msra.gmra.mxu0 %vm151_vm0, %v400_v15  ;;  %vm477_vm0 = vcmp.lt.s32.totalorder %v1177_v13, 8 }
 0x15c   :  { %v437_v18 = vpop.f32.mrf.mxu0 }
 0x15d   :  { %v454_v24 = vsel %vm453_vm10, %v437_v18, 0.0  ;;  %v471_v23 = vmul.f32 1.442695, %v437_v18 }
 0x15e   :  { %v457_v19 = vsel %vm456_vm11, %v454_v24, 0.0 }
 0x15f   :  { %664 = vpow2.f32 %v471_v23  ;;  %458 = vadd.xlane.f32.xlu2 %v457_v19  ;;  %v463_v3 = vrot.slane %v457_v19, 4 }
 0x161   :  { %v464_v38 = vadd.f32 %v463_v3, %v457_v19 }
 0x163   :  { %v465_v32 = vrot.slane %v464_v38, 2 }
 0x164   :  { %v439_v14 = vpop.f32.mrf.mxu0 }
 0x165   :  { %v665_v29 = vpop.eup %664  ;;  %v466_v41 = vadd.f32 %v465_v32, %v464_v38 }
 0x166   :  { %v494_v30 = vsel %vm456_vm11, %v665_v29, 0.0  ;;  %v478_v31 = vsel %vm477_vm0, %v665_v29, 0.0 }
 0x167   :  { %v495_v55 = vrot.slane %v494_v30, 4  ;;  %v479_v22 = vsel %vm456_vm11, %v478_v31, 0.0  ;;  %v467_v20 = vrot.slane %v466_v41, 1 }
 0x168   :  { %480 = vadd.xlane.f32.xlu0 %v479_v22 }
 0x169   :  { %v496_v37 = vadd.f32 %v495_v55, %v494_v30  ;;  %v468_v46 = vadd.f32 %v467_v20, %v466_v41 }
 0x16b   :  { %v497_v39 = vrot.slane %v496_v37, 2 }
 0x16d   :  { %v498_v21 = vadd.f32 %v497_v39, %v496_v37 }
 0x16f   :  { %v499_v40 = vrot.slane %v498_v21, 1 }
 0x171   :  { %v500_v42 = vadd.f32 %v499_v40, %v498_v21 }
 0x173   :  { %666 = vlog2.f32 %v500_v42 }
 0x179   :  { %v667_v35 = vpop.eup %666 }
 0x17a   :  { %v502_v12 = vmul.f32 0.6931472, %v667_v35 }
 0x17c   :  { %v503_v26 = vsub.f32 %v502_v12, %v468_v46  ;;  %526 = vperm.xlu0 %629, %v509_v9  }
 0x17e   :  { %504 = vst [vmem:[#allocation8] sm:$0x1] %v503_v26 }
 0x17f   :  { %543 = dma.vmem_to_hbm [thread:$0]  %s539_s5, 16, %s541_s30, [#allocation9]  }
 0x1d2   :  { %v459_v25 = vpop.xlane.xlu2 %458 }
 0x1d3   :  { %v460_v28 = vadd.f32 %v459_v25, %v455_v7 }
 0x1d5   :  { %462 = vst.msk [vmem:[#allocation6] sm:$0xf] %vm99_vm9, %v460_v28 }
 0x1db   :  { %v481_v27 = vpop.xlane.xlu0 %480 }
 0x1dc   :  { %v482_v50 = vadd.f32 %v481_v27, %v476_v0  ;;  %v512_v62 = vld [vmem:[#allocation6] sm:$0xf] }
 0x1dd   :  { %520 = vperm.xlu2 %628, %v512_v62  }
 0x1de   :  { %483 = vst.msk [vmem:[#allocation5] sm:$0xf] %vm99_vm9, %v482_v50 }
 0x1e5   :  { %v511_v51 = vld [vmem:[#allocation5] sm:$0xf] }
 0x1e6   :  { %515 = vperm.xlu1 %627, %v511_v51  }
 0x1ee   :  { %v527_v6 = vpop.permute.xlu0 %526 }
 0x237   :  { %v521_v17 = vpop.permute.xlu2 %520 }
 0x258   :  { %v516_v60 = vpop.permute.xlu1 %515 }
 0x259   :  { %v523_v57 = vsel %vm510_vm12, %v516_v60, %v521_v17 }
 0x25a   :  { %v529_v1 = vsel %vm508_vm13, %v527_v6, %v523_v57 }
 0x25b   :  { %530 = vst [vmem:[#allocation10] sm:$0xf] %v529_v1 }
 0x25c   :  { %554 = dma.vmem_to_hbm [thread:$0]  %s550_s7, 64, %s552_s2, [#allocation11]  }
 0x25d   :  { %718 = dma.done.wait [#allocation9], 16  }
 0x25e   :  { %719 = vsyncadd [#allocation9], 4294967280 }
 0x25f   :  { %720 = dma.done.wait [#allocation11], 64  }
 0x260   :  { %721 = vsyncadd [#allocation11], 4294967232 }
 0x261   :  { %563 = vsyncpa [#allocation9], 1 }
 0x262   :  { %564 = vsyncpa [#allocation11], 1 }
 0x263   :  { %565 = vsyncmov [#allocation7] }
 0x266   :  { %s566_s10 = vpop.sfrf %565 }
 0x267   :  { %p583_p0 = scmp.ne.s32.totalorder %s566_s10, 0 }
 0x269   :  { %570 = shalt.err (%p583_p0)  }

</bundles_post_ra>
